<compile_context>
chip_gen: v7x
topology: tpu7x:2x2x1
jax: 0.10.0
libtpu: 0.0.40
codegen_flags: <defaults>
</compile_context>

<pallas_src>
import functools

import jax
import jax.numpy as jnp
from jax.experimental import pallas as pl
from jax.experimental.pallas import tpu as pltpu

LANE = 128  # lane width (last dim)


def _round_up(x, m):
    return (x + m - 1) // m * m


def linear_kernel(x_ref, wt_ref, b_ref, o_ref):
    # x_ref : [B, K]        (VMEM)  raw activations, K = logical input_dim
    # wt_ref: [K, N_pad]    (VMEM)  pre-transposed weight, lane-padded in N
    # b_ref : [1, N_pad]    (VMEM)  lane-padded bias
    # o_ref : [B, N_pad]    (VMEM)  lane-dense output slab
    acc = jnp.dot(x_ref[...], wt_ref[...], preferred_element_type=jnp.float32)
    o_ref[...] = (acc + b_ref[...].astype(jnp.float32)).astype(o_ref.dtype)


def prepare_params(weight, bias, param_dtype=jnp.float32):
    """One-time (outside the hot path) weight transpose + output-lane padding.

    weight: [hidden_dim, input_dim], bias: [hidden_dim]
    returns (wt_padded [input_dim, N_pad], bias_padded [1, N_pad], hidden_dim)

    param_dtype=jnp.bfloat16 halves weight DMA bytes and uses the native MXU
    input type on v6e/v7x — worthwhile once M is batched up; f32 keeps the
    result bit-tight vs the PyTorch f32 reference.
    """
    hidden_dim, input_dim = weight.shape
    n_pad = _round_up(hidden_dim, LANE)
    wt_padded = (
        jnp.zeros((input_dim, n_pad), param_dtype)
        .at[:, :hidden_dim].set(weight.T.astype(param_dtype))
    )
    bias_padded = (
        jnp.zeros((1, n_pad), param_dtype)
        .at[0, :hidden_dim].set(bias.astype(param_dtype))
    )
    return wt_padded, bias_padded, hidden_dim


@functools.partial(jax.jit, static_argnames=("hidden_dim", "return_padded"))
def nn_extractor_forward(pretime, wt_padded, bias_padded, hidden_dim,
                         return_padded=False):
    """pretime: [B, input_dim] f32; wt_padded/bias_padded from prepare_params.

    Returns [B, hidden_dim], or the lane-dense [B, N_pad] slab when
    return_padded=True (lets a downstream consumer skip the boundary slice).
    """
    B, input_dim = pretime.shape
    k_dim, n_pad = wt_padded.shape
    assert k_dim == input_dim, "pretime feature dim must match weight"

    out_padded = pl.pallas_call(
        linear_kernel,
        out_shape=jax.ShapeDtypeStruct((B, n_pad), pretime.dtype),
        in_specs=[
            pl.BlockSpec(memory_space=pltpu.MemorySpace.VMEM),
            pl.BlockSpec(memory_space=pltpu.MemorySpace.VMEM),
            pl.BlockSpec(memory_space=pltpu.MemorySpace.VMEM),
        ],
        out_specs=pl.BlockSpec(memory_space=pltpu.MemorySpace.VMEM),
        cost_estimate=pl.CostEstimate(
            flops=2 * B * input_dim * hidden_dim,
            transcendentals=0,
            bytes_accessed=4 * (B * input_dim + input_dim * hidden_dim
                                + hidden_dim + B * hidden_dim),
        ),
    )(pretime, wt_padded, bias_padded)

    if return_padded:
        return out_padded
    # Single boundary slice; fused by XLA since we are inside jit.
    return out_padded[:, :hidden_dim]


if __name__ == "__main__":
    input_dim = 120          # module default
    hidden_dim = 32
    batch = 8

    key = jax.random.PRNGKey(0)
    k_x, k_w, k_b = jax.random.split(key, 3)

    # Deterministic synthetic parameters (PyTorch-style uniform bound 1/sqrt(fan_in)).
    bound = 1.0 / (input_dim ** 0.5)
    weight = jax.random.uniform(k_w, (hidden_dim, input_dim),
                                minval=-bound, maxval=bound, dtype=jnp.float32)
    bias = jax.random.uniform(k_b, (hidden_dim,),
                              minval=-bound, maxval=bound, dtype=jnp.float32)

    pretime = jax.random.normal(k_x, (batch, input_dim), dtype=jnp.float32)

    # One-time parameter prep (transpose + output-lane pad), outside the hot path.
    wt_padded, bias_padded, hd = prepare_params(weight, bias)

    emb = nn_extractor_forward(pretime, wt_padded, bias_padded, hd)
    emb = jax.block_until_ready(emb)

    # Correctness check against plain-JAX reference of the PyTorch semantics.
    ref = pretime @ weight.T + bias
    assert emb.shape == (batch, hidden_dim)
    assert jnp.allclose(emb, ref, atol=1e-5, rtol=1e-5)

    print("KERNEL_OK")
</pallas_src>

<mosaic_0001>
module attributes {stable_mosaic.version = 11 : i64} {
  func.func @linear_kernel(%arg0: memref<8x120xf32, #tpu.memory_space<vmem>>, %arg1: memref<120x128xf32, #tpu.memory_space<vmem>>, %arg2: memref<1x128xf32, #tpu.memory_space<vmem>>, %arg3: memref<8x128xf32, #tpu.memory_space<vmem>>) attributes {dimension_semantics = [], scalar_prefetch = 0 : i64, scratch_operands = 0 : i64, tpu.core_type = #tpu.core_type<tc>} {
    %c0 = arith.constant 0 : index
    %c0_0 = arith.constant 0 : index
    %0 = vector.load %arg0[%c0, %c0_0] : memref<8x120xf32, #tpu.memory_space<vmem>>, vector<8x120xf32>
    %c0_1 = arith.constant 0 : index
    %c0_2 = arith.constant 0 : index
    %1 = vector.load %arg1[%c0_1, %c0_2] : memref<120x128xf32, #tpu.memory_space<vmem>>, vector<120x128xf32>
    %cst = arith.constant dense<0.000000e+00> : vector<8x128xf32>
    %2 = tpu.matmul %0, %1, %cst {dimension_numbers = #tpu.dot_dimension_numbers<[1], [0], [0], [1], [0, 0, 1, 1], [], []>} : vector<8x120xf32>, vector<120x128xf32>, vector<8x128xf32> -> vector<8x128xf32>
    %c0_3 = arith.constant 0 : index
    %c0_4 = arith.constant 0 : index
    %3 = vector.load %arg2[%c0_3, %c0_4] : memref<1x128xf32, #tpu.memory_space<vmem>>, vector<1x128xf32>
    %4 = vector.broadcast %3 : vector<1x128xf32> to vector<8x128xf32>
    %5 = arith.addf %2, %4 : vector<8x128xf32>
    %c0_5 = arith.constant 0 : index
    %c0_6 = arith.constant 0 : index
    %6 = vector.load %arg3[%c0_5, %c0_6] : memref<8x128xf32, #tpu.memory_space<vmem>>, vector<8x128xf32>
    tpu.vector_store %arg3[%c0_5, %c0_6], %5 {strides = array<i32>} : memref<8x128xf32, #tpu.memory_space<vmem>>, vector<8x128xf32>,
    return
  }
}

</mosaic_0001>

<bundles_post_ra>
// kernel: nn_extractor_forward.1
= control target key start
LH: loop header
LB: loop body
LE: loop exit
PB: predicated region body
PF: predicated region fallthrough
CT: control target
= control target key end

     0   :  { %8 = vsyncpa [#allocation3], 0  ;;  %s381_s0 = inlined_call_operand.hbm [shape: f32[8,120], index: 0, kind: input, shape index: {}]   ;;  %s382_s1 = inlined_call_operand.hbm [shape: f32[120,128], index: 1, kind: input, shape index: {}]   ;;  %s383_s2 = inlined_call_operand.vmem [shape: f32[1,128], index: 2, kind: input, shape index: {}]   ;;  %s384_s3 = inlined_call_operand.hbm [shape: f32[8,128], index: 3, kind: output, shape index: {}]  }
   0x1   :  { %9 = vsyncpa [#allocation6], 0 }
   0x2   :  { %10 = vsyncpa [#allocation4], 0  ;;  %s307_s12 = smov [#allocation2]   ;;  %s308_s14 = smov [#allocation5]  }
   0x3   :  { %s17_s13 = sshll.u32 %s307_s12, 4  ;;  %s26_s15 = sshll.u32 %s308_s14, 4  ;;  %s18_s13 = int_to_ptr.vmem [resolvable:$true] %s17_s13  ;;  %s335_s15 = int_to_ptr.vmem [resolvable:$true] %s26_s15 }
   0x4   :  { %s235_s18 = scalar_lea.hbm %s381_s0, 128 }
   0x5   :  { %p236_p0 = scmp.ne.s32.totalorder %s381_s0, %s235_s18  ;;  %p239_p1 = scmp.lt.u32.totalorder %s235_s18, %s381_s0 }
   0x7   :  { %p241_p2 = pnand %p239_p1, %p236_p0 }
   0x9   :  { %244 = shalt.err (!%p241_p2)
}
   0xa   :  { %s245_s23 = scalar_lea.vmem %s18_s13, 128  ;;  %p250_p4 = scmp.lt.s32.totalorder %s18_s13, %s18_s13 }
   0xb   :  { %p246_p3 = scmp.ne.s32.totalorder %s18_s13, %s245_s23  ;;  %p251_p5 = scmp.lt.s32.totalorder %s245_s23, %s245_s23 }
   0xd   :  { %p252_p6 = por %p251_p5, %p250_p4 }
   0xf   :  { %p253_p7 = pnand %p252_p6, %p246_p3 }
  0x11   :  { %256 = shalt.err (!%p253_p7)
}
  0x12   :  { %20 = dma.hbm_to_vmem [thread:$0]  %s381_s0, 128, %s18_s13, [#allocation3]  }
  0x13   :  { %s257_s28 = scalar_lea.hbm %s382_s1, 1920 }
  0x14   :  { %p258_p8 = scmp.ne.s32.totalorder %s382_s1, %s257_s28  ;;  %p261_p9 = scmp.lt.u32.totalorder %s257_s28, %s382_s1 }
  0x16   :  { %p263_p10 = pnand %p261_p9, %p258_p8 }
  0x18   :  { %266 = shalt.err (!%p263_p10)
}
  0x19   :  { %s267_s6 = scalar_lea.vmem %s335_s15, 1920  ;;  %p272_p12 = scmp.lt.s32.totalorder %s335_s15, %s335_s15 }
  0x1a   :  { %p268_p11 = scmp.ne.s32.totalorder %s335_s15, %s267_s6  ;;  %p273_p13 = scmp.lt.s32.totalorder %s267_s6, %s267_s6 }
  0x1c   :  { %p274_p0 = por %p273_p13, %p272_p12 }
  0x1e   :  { %p275_p1 = pnand %p274_p0, %p268_p11 }
  0x20   :  { %278 = shalt.err (!%p275_p1)
}
  0x21   :  { %s309_s0 = smov 128   ;;  %s310_s7 = smov 8  }
  0x22   :  { %32 = dma.hbm_to_vmem [thread:$0]  %s382_s1, 1920, %s335_s15, [#allocation6], %s309_s0, %s309_s0, %s310_s7  }
  0x23   :  { %301 = dma.done.wait [#allocation3], 128  }
  0x24   :  { %302 = vsyncadd [#allocation3], 4294967168 }
  0x25   :  { %303 = dma.done.wait [#allocation6], 1920  }
  0x26   :  { %304 = vsyncadd [#allocation6], 4294965376  ;;  %v311_v0 = vmov 0.0|0.0   ;;  %vm312_vm0 = vmmov 0   ;;  %v313_v1 = vmov 0.0   ;;  %v42_v2 = vld [vmem:[#allocation5] sm:$0xff] }
  0x27   :  { %206 = vmatprep.subr.bf16.mxu0 %v311_v0  ;;  %203 = vmatprep.mubr.msk.f32.mxu0 %vm312_vm0, %v313_v1  ;;  %v43_v3 = vld [vmem:[#allocation5 + $0x8] sm:$0xff]  ;;  %v44_v4 = vld [vmem:[#allocation5 + $0x10] sm:$0xff]  ;;  %v45_v6 = vld [vmem:[#allocation5 + $0x18] sm:$0xff]  ;;  %vm64_vm1 = vcmask 982016   ;;  %s314_s11 = smov [#allocation7]  }
  0x28   :  { %v207_v5 = vpack.c.bf16 %v43_v3, %v42_v2  ;;  %v210_v7 = vpack.c.bf16 %v45_v6, %v44_v4  ;;  %v46_v8 = vld [vmem:[#allocation5 + $0x20] sm:$0xff]  ;;  %v47_v9 = vld [vmem:[#allocation5 + $0x28] sm:$0xff]  ;;  %v48_v11 = vld [vmem:[#allocation5 + $0x30] sm:$0xff]  ;;  %s145_s12 = sshll.u32 %s314_s11, 4  ;;  %s146_s12 = int_to_ptr.vmem [resolvable:$true] %s145_s12 }
  0x29   :  { %v213_v10 = vpack.c.bf16 %v47_v9, %v46_v8  ;;  %v49_v12 = vld [vmem:[#allocation5 + $0x38] sm:$0xff]  ;;  %v50_v14 = vld [vmem:[#allocation5 + $0x40] sm:$0xff]  ;;  %v51_v15 = vld [vmem:[#allocation5 + $0x48] sm:$0xff]  ;;  %s279_s13 = scalar_lea.vmem %s146_s12, 128  ;;  %p284_p3 = scmp.lt.s32.totalorder %s146_s12, %s146_s12 }
  0x2a   :  { %208 = vmatpush3.bf16.msra.mxu0 %v207_v5  ;;  %v216_v13 = vpack.c.bf16 %v49_v12, %v48_v11  ;;  %v219_v16 = vpack.c.bf16 %v51_v15, %v50_v14  ;;  %v52_v17 = vld [vmem:[#allocation5 + $0x50] sm:$0xff]  ;;  %v53_v18 = vld [vmem:[#allocation5 + $0x58] sm:$0xff]  ;;  %v54_v20 = vld [vmem:[#allocation5 + $0x60] sm:$0xff]  ;;  %p280_p2 = scmp.ne.s32.totalorder %s146_s12, %s279_s13  ;;  %p285_p4 = scmp.lt.s32.totalorder %s279_s13, %s279_s13 }
  0x2b   :  { %209 = vmatprep.subr.bf16.mxu0 %v311_v0  ;;  %v222_v19 = vpack.c.bf16 %v53_v18, %v52_v17  ;;  %v55_v21 = vld [vmem:[#allocation5 + $0x68] sm:$0xff]  ;;  %v56_v23 = vld [vmem:[#allocation5 + $0x70] sm:$0xff]  ;;  %v41_v24 = vld [vmem:[#allocation2] sm:$0xff] }
  0x2c   :  { %v225_v22 = vpack.c.bf16 %v55_v21, %v54_v20  ;;  %v155_v25 = vld [vmem:[%s383_s2] ss:$0 sm:$0xff]  ;;  %p286_p5 = por %p285_p4, %p284_p3 }
  0x2e   :  { %211 = vmatpush3.bf16.msra.mxu0 %v210_v7  ;;  %p287_p6 = pnand %p286_p5, %p280_p2 }
  0x2f   :  { %212 = vmatprep.subr.bf16.mxu0 %v311_v0 }
  0x32   :  { %214 = vmatpush3.bf16.msra.mxu0 %v213_v10 }
  0x33   :  { %215 = vmatprep.subr.bf16.mxu0 %v311_v0 }
  0x36   :  { %217 = vmatpush3.bf16.msra.mxu0 %v216_v13 }
  0x37   :  { %218 = vmatprep.subr.bf16.mxu0 %v311_v0 }
  0x3a   :  { %220 = vmatpush3.bf16.msra.mxu0 %v219_v16 }
  0x3b   :  { %221 = vmatprep.subr.bf16.mxu0 %v311_v0 }
  0x3e   :  { %223 = vmatpush3.bf16.msra.mxu0 %v222_v19 }
  0x3f   :  { %224 = vmatprep.subr.bf16.mxu0 %v311_v0 }
  0x42   :  { %226 = vmatpush3.bf16.msra.mxu0 %v225_v22 }
  0x43   :  { %201 = vmatprep.subr.mxu0 %v313_v1 }
  0x46   :  { %202 = vmatpush3.msra.mxu0 %v56_v23 }
  0x47   :  { %204 = vmatmul.mubr.msk.f32.vlgmr.msra.gmra.mrb[0].mxu0 %vm64_vm1, %v41_v24 }
 0x11a   :  { %v134_v26 = vpop.f32.mrb[0].mxu0 }
 0x11b   :  { %v135_v27 = vadd.f32 %v155_v25, %v134_v26  ;;  %v205_v28 = vpop.f32.mrb[1].mxu0 }
 0x11d   :  { %138 = vst [vmem:[#allocation7] sm:$0xff] %v135_v27 }
 0x11e   :  { %290 = shalt.err (!%p287_p6)
}
 0x11f   :  { %s291_s16 = scalar_lea.hbm %s384_s3, 128 }
 0x120   :  { %p292_p7 = scmp.ne.s32.totalorder %s384_s3, %s291_s16  ;;  %p295_p8 = scmp.lt.u32.totalorder %s291_s16, %s384_s3 }
 0x122   :  { %p297_p9 = pnand %p295_p8, %p292_p7 }
 0x124   :  { %300 = shalt.err (!%p297_p9)
}
 0x125   :  { %148 = dma.vmem_to_hbm [thread:$0]  %s146_s12, 128, %s384_s3, [#allocation4]  }
 0x126   :  { %305 = dma.done.wait [#allocation4], 128  }
 0x127   :  { %306 = vsyncadd [#allocation4], 4294967168 }
 0x128   :  { %152 = vsyncpa [#allocation3], 1 }
 0x129   :  { %153 = vsyncpa [#allocation6], 1 }
 0x12a   :  { %154 = vsyncpa [#allocation4], 1 }

</bundles_post_ra>
